<compile_context>
chip_gen: v7x
topology: tpu7x:2x2x1
jax: 0.10.0
libtpu: 0.0.40
codegen_flags: <defaults>
</compile_context>

<pallas_src>
from functools import partial

import jax
import jax.numpy as jnp
from jax import lax
from jax.experimental import pallas as pl
from jax.experimental.pallas import tpu as pltpu


_BLOCK_BYTES_TARGET = 1 << 20          # ~1 MiB per input block (HBM-roofline plateau)
_MAX_TILE_HW = 32 * 1024               # lane-tile cap (keeps unrolled chunk loop sane)
_VMEM_LIMIT = 40 * 1024 * 1024         # scoped-VMEM cap; big headroom on v7x (64 MiB phys)


def _round_up(v, m):
    return ((v + m - 1) // m) * m


def _round_down(v, m):
    return max(m, (v // m) * m)


def _soft_dice_kernel(x_ref, y_ref, tp_ref, s_ref, *, hw, tile_hw, j_per, need_mask):
    """Accumulate per-row, per-lane partial sums of x*y and x+y.

    x_ref, y_ref : (tile_rows, tile_hw) input tiles in VMEM (native dtype)
    tp_ref, s_ref: (tile_rows, 128) f32 output blocks, revisited across the
                   innermost ("arbitrary") hw grid axis -> used directly as
                   accumulators.  Cross-lane reduce is deferred to the wrapper.
    """
    j = pl.program_id(2)

    @pl.when(j == 0)
    def _():
        tp_ref[...] = jnp.zeros_like(tp_ref)
        s_ref[...] = jnp.zeros_like(s_ref)

    x = x_ref[...].astype(jnp.float32)
    y = y_ref[...].astype(jnp.float32)

    xy = x * y          # -> tp
    xs = x + y          # -> 2*tp + fp + fn
    if need_mask:
        # Global hw-block index (UNclamped; the index_map clamps the DMA, the
        # mask zeroes out-of-range / ragged-tail lanes before accumulation).
        blk = pl.program_id(0) * j_per + j
        col = blk * tile_hw + lax.broadcasted_iota(jnp.int32, x.shape, 1)
        valid = col < hw
        xy = jnp.where(valid, xy, 0.0)
        xs = jnp.where(valid, xs, 0.0)

    # Deferred reduce: fold tile_hw into 128-lane columns with plain VALU adds.
    tp = tp_ref[...]
    s = s_ref[...]
    for c in range(tile_hw // 128):
        sl = slice(c * 128, (c + 1) * 128)
        tp = tp + xy[:, sl]
        s = s + xs[:, sl]
    tp_ref[...] = tp
    s_ref[...] = s


def soft_dice_loss(x, y, *, smooth=1.0, tile_rows=None, tile_hw=None):
    """x, y: (N, C, H, W) arrays (NCHW). Returns scalar f32 loss = 1 - mean dice."""
    N, C, H, W = x.shape
    rows, hw = N * C, H * W

    # Flatten reduction dims; keep native dtypes on the wire (kernel accumulates f32).
    x2 = x.reshape(rows, hw)
    y2 = y.reshape(rows, hw)
    x_it = jnp.dtype(x2.dtype).itemsize
    y_it = jnp.dtype(y2.dtype).itemsize
    itemsize = max(x_it, y_it)

    # ---- tile selection ----------------------------------------------------
    if tile_hw is None:
        tile_hw = min(_round_up(hw, 128),
                      _round_down(_BLOCK_BYTES_TARGET // (8 * itemsize), 128),
                      _MAX_TILE_HW)
    assert tile_hw % 128 == 0, "tile_hw must be a multiple of 128"

    if tile_rows is None:
        tile_rows = min(_round_up(rows, 8),
                        _round_down(_BLOCK_BYTES_TARGET // (tile_hw * itemsize), 8))
        # If the whole spatial extent fits in one lane tile, make sure the
        # (parallel) row axis still has >= 2 tiles so both v7x TCs get work.
        if _round_up(hw, 128) <= tile_hw and rows > 8:
            tile_rows = min(tile_rows, _round_up(pl.cdiv(rows, 2), 8))
    assert tile_rows % 8 == 0 or tile_rows == rows

    num_row_tiles = pl.cdiv(rows, tile_rows)
    j_total = pl.cdiv(hw, tile_hw)
    # Split the hw reduction across a leading "parallel" axis only when the row
    # axis cannot feed both TensorCores; partials are summed in the wrapper.
    p_split = 2 if (num_row_tiles == 1 and j_total >= 2) else 1
    j_per = pl.cdiv(j_total, p_split)

    need_mask = (hw % tile_hw != 0) or (p_split * j_per != j_total)
    if p_split * j_per == j_total:
        in_idx = lambda p, i, j: (i, p * j_per + j)
    else:  # last (p, j) step maps past the array: clamp the DMA, mask in-kernel
        in_idx = lambda p, i, j: (i, jnp.minimum(p * j_per + j, j_total - 1))

    r_pad = num_row_tiles * tile_rows
    grid = (p_split, num_row_tiles, j_per)

    kernel = partial(_soft_dice_kernel, hw=hw, tile_hw=tile_hw, j_per=j_per,
                     need_mask=need_mask)

    tp_part, s_part = pl.pallas_call(
        kernel,
        out_shape=(
            jax.ShapeDtypeStruct((p_split, r_pad, 128), jnp.float32),
            jax.ShapeDtypeStruct((p_split, r_pad, 128), jnp.float32),
        ),
        grid_spec=pltpu.PrefetchScalarGridSpec(
            num_scalar_prefetch=0,
            grid=grid,
            # Optional v6e polish: sweep pipeline_mode=pl.Buffered(3) here if a
            # profile shows exposed DMA waits (plenty of VMEM on v5e/v6e).
            in_specs=[
                pl.BlockSpec((tile_rows, tile_hw), in_idx),
                pl.BlockSpec((tile_rows, tile_hw), in_idx),
            ],
            out_specs=(
                pl.BlockSpec((None, tile_rows, 128), lambda p, i, j: (p, i, 0)),
                pl.BlockSpec((None, tile_rows, 128), lambda p, i, j: (p, i, 0)),
            ),
        ),
        compiler_params=pltpu.CompilerParams(
            dimension_semantics=("parallel", "parallel", "arbitrary"),
            vmem_limit_bytes=_VMEM_LIMIT,
        ),
        cost_estimate=pl.CostEstimate(
            flops=4 * rows * hw,
            transcendentals=0,
            bytes_accessed=rows * hw * (x_it + y_it) + 2 * p_split * r_pad * 128 * 4,
        ),
    )(x2, y2)

    # Tiny finishing reductions on the per-(P, row, lane) partial sums.
    tp = tp_part[:, :rows, :].sum(axis=(0, 2))      # sum(x*y)          per (n, c)
    s = s_part[:, :rows, :].sum(axis=(0, 2))        # sum(x) + sum(y) = 2tp+fp+fn
    dc = (2.0 * tp + smooth) / (s + smooth)
    return (1.0 - jnp.mean(dc)).astype(jnp.float32)


if __name__ == "__main__":
    k1, k2, k3, k4, k5, k6 = jax.random.split(jax.random.PRNGKey(0), 6)

    def reference(x, y, smooth=1.0):
        tp = (x * y).sum((-2, -1))
        fp = (x * (1.0 - y)).sum((-2, -1))
        fn = ((1.0 - x) * y).sum((-2, -1))
        dc = (2.0 * tp + smooth) / (2.0 * tp + fp + fn + smooth)
        return 1.0 - dc.mean()

    # Case 1: aligned small shape (N=2, C=4, H=16, W=16) -> single-block grid.
    x1 = jax.random.uniform(k1, (2, 4, 16, 16), dtype=jnp.float32)
    y1 = (jax.random.uniform(k2, (2, 4, 16, 16)) > 0.5).astype(jnp.float32)
    out1 = jax.block_until_ready(soft_dice_loss(x1, y1, smooth=1.0))
    ref1 = reference(x1, y1)
    assert jnp.allclose(out1, ref1, atol=1e-5, rtol=1e-5), (out1, ref1)

    # Case 2: ragged rows (3) and ragged lanes (hw=100 < 128) -> masked tail.
    x2 = jax.random.uniform(k3, (1, 3, 10, 10), dtype=jnp.float32)
    y2 = (jax.random.uniform(k4, (1, 3, 10, 10)) > 0.5).astype(jnp.float32)
    out2 = jax.block_until_ready(soft_dice_loss(x2, y2, smooth=1.0))
    ref2 = reference(x2, y2)
    assert jnp.allclose(out2, ref2, atol=1e-5, rtol=1e-5), (out2, ref2)

    # Case 3: forced small lane tile -> exercises the P=2 hw split, the clamped
    # out-of-range block, the ragged lane mask and multi-step accumulation.
    x3 = jax.random.uniform(k5, (2, 4, 24, 24), dtype=jnp.float32)
    y3 = (jax.random.uniform(k6, (2, 4, 24, 24)) > 0.5).astype(jnp.float32)
    out3 = jax.block_until_ready(soft_dice_loss(x3, y3, smooth=1.0, tile_hw=128))
    ref3 = reference(x3, y3)
    assert jnp.allclose(out3, ref3, atol=1e-5, rtol=1e-5), (out3, ref3)

    print("KERNEL_OK")
</pallas_src>

<mosaic_0001>
module attributes {stable_mosaic.version = 11 : i64} {
  func.func @_soft_dice_kernel(%arg0: i32, %arg1: i32, %arg2: i32, %arg3: memref<8x256xf32, #tpu.memory_space<vmem>>, %arg4: memref<8x256xf32, #tpu.memory_space<vmem>>, %arg5: memref<1x8x128xf32, #tpu.memory_space<vmem>>, %arg6: memref<1x8x128xf32, #tpu.memory_space<vmem>>) attributes {dimension_semantics = [#tpu.dimension_semantics<parallel>, #tpu.dimension_semantics<parallel>, #tpu.dimension_semantics<arbitrary>], iteration_bounds = array<i64: 1, 1, 1>, scalar_prefetch = 0 : i64, scratch_operands = 0 : i64, tpu.core_type = #tpu.core_type<tc>, window_params = [{transform_indices = @transform_0, window_bounds = array<i64: 8, 256>}, {transform_indices = @transform_1, window_bounds = array<i64: 8, 256>}, {transform_indices = @transform_2, window_bounds = array<i64: 1, 8, 128>}, {transform_indices = @transform_3, window_bounds = array<i64: 1, 8, 128>}]} {
    %c0_i32 = arith.constant 0 : i32
    %0 = arith.cmpi eq, %arg2, %c0_i32 : i32
    %1 = arith.extui %0 : i1 to i32
    %c0_i32_0 = arith.constant 0 : i32
    %2 = arith.cmpi ne, %1, %c0_i32_0 : i32
    scf.if %2 {
      %cst = arith.constant 0.000000e+00 : f32
      %25 = vector.broadcast %cst : f32 to vector<8x128xf32>
      %c0_16 = arith.constant 0 : index
      %c0_17 = arith.constant 0 : index
      %c0_18 = arith.constant 0 : index
      %26 = vector.load %arg5[%c0_16, %c0_17, %c0_18] : memref<1x8x128xf32, #tpu.memory_space<vmem>>, vector<1x8x128xf32>
      %27 = vector.shape_cast %26 : vector<1x8x128xf32> to vector<8x128xf32>
      %28 = vector.shape_cast %25 : vector<8x128xf32> to vector<1x8x128xf32>
      tpu.vector_store %arg5[%c0_16, %c0_17, %c0_18], %28 {strides = array<i32>} : memref<1x8x128xf32, #tpu.memory_space<vmem>>, vector<1x8x128xf32>,
      %cst_19 = arith.constant 0.000000e+00 : f32
      %29 = vector.broadcast %cst_19 : f32 to vector<8x128xf32>
      %c0_20 = arith.constant 0 : index
      %c0_21 = arith.constant 0 : index
      %c0_22 = arith.constant 0 : index
      %30 = vector.load %arg6[%c0_20, %c0_21, %c0_22] : memref<1x8x128xf32, #tpu.memory_space<vmem>>, vector<1x8x128xf32>
      %31 = vector.shape_cast %30 : vector<1x8x128xf32> to vector<8x128xf32>
      %32 = vector.shape_cast %29 : vector<8x128xf32> to vector<1x8x128xf32>
      tpu.vector_store %arg6[%c0_20, %c0_21, %c0_22], %32 {strides = array<i32>} : memref<1x8x128xf32, #tpu.memory_space<vmem>>, vector<1x8x128xf32>,
    } else {
    }
    %c0 = arith.constant 0 : index
    %c0_1 = arith.constant 0 : index
    %3 = vector.load %arg3[%c0, %c0_1] : memref<8x256xf32, #tpu.memory_space<vmem>>, vector<8x256xf32>
    %c0_2 = arith.constant 0 : index
    %c0_3 = arith.constant 0 : index
    %4 = vector.load %arg4[%c0_2, %c0_3] : memref<8x256xf32, #tpu.memory_space<vmem>>, vector<8x256xf32>
    %5 = arith.mulf %3, %4 : vector<8x256xf32>
    %6 = arith.addf %3, %4 : vector<8x256xf32>
    %c0_4 = arith.constant 0 : index
    %c0_5 = arith.constant 0 : index
    %c0_6 = arith.constant 0 : index
    %7 = vector.load %arg5[%c0_4, %c0_5, %c0_6] : memref<1x8x128xf32, #tpu.memory_space<vmem>>, vector<1x8x128xf32>
    %8 = vector.shape_cast %7 : vector<1x8x128xf32> to vector<8x128xf32>
    %c0_7 = arith.constant 0 : index
    %c0_8 = arith.constant 0 : index
    %c0_9 = arith.constant 0 : index
    %9 = vector.load %arg6[%c0_7, %c0_8, %c0_9] : memref<1x8x128xf32, #tpu.memory_space<vmem>>, vector<1x8x128xf32>
    %10 = vector.shape_cast %9 : vector<1x8x128xf32> to vector<8x128xf32>
    %11 = vector.extract_strided_slice %5 {offsets = [0, 0], sizes = [8, 128], strides = [1, 1]} : vector<8x256xf32> to vector<8x128xf32>
    %12 = arith.addf %8, %11 : vector<8x128xf32>
    %13 = vector.extract_strided_slice %6 {offsets = [0, 0], sizes = [8, 128], strides = [1, 1]} : vector<8x256xf32> to vector<8x128xf32>
    %14 = arith.addf %10, %13 : vector<8x128xf32>
    %15 = vector.extract_strided_slice %5 {offsets = [0, 128], sizes = [8, 128], strides = [1, 1]} : vector<8x256xf32> to vector<8x128xf32>
    %16 = arith.addf %12, %15 : vector<8x128xf32>
    %17 = vector.extract_strided_slice %6 {offsets = [0, 128], sizes = [8, 128], strides = [1, 1]} : vector<8x256xf32> to vector<8x128xf32>
    %18 = arith.addf %14, %17 : vector<8x128xf32>
    %c0_10 = arith.constant 0 : index
    %c0_11 = arith.constant 0 : index
    %c0_12 = arith.constant 0 : index
    %19 = vector.load %arg5[%c0_10, %c0_11, %c0_12] : memref<1x8x128xf32, #tpu.memory_space<vmem>>, vector<1x8x128xf32>
    %20 = vector.shape_cast %19 : vector<1x8x128xf32> to vector<8x128xf32>
    %21 = vector.shape_cast %16 : vector<8x128xf32> to vector<1x8x128xf32>
    tpu.vector_store %arg5[%c0_10, %c0_11, %c0_12], %21 {strides = array<i32>} : memref<1x8x128xf32, #tpu.memory_space<vmem>>, vector<1x8x128xf32>,
    %c0_13 = arith.constant 0 : index
    %c0_14 = arith.constant 0 : index
    %c0_15 = arith.constant 0 : index
    %22 = vector.load %arg6[%c0_13, %c0_14, %c0_15] : memref<1x8x128xf32, #tpu.memory_space<vmem>>, vector<1x8x128xf32>
    %23 = vector.shape_cast %22 : vector<1x8x128xf32> to vector<8x128xf32>
    %24 = vector.shape_cast %18 : vector<8x128xf32> to vector<1x8x128xf32>
    tpu.vector_store %arg6[%c0_13, %c0_14, %c0_15], %24 {strides = array<i32>} : memref<1x8x128xf32, #tpu.memory_space<vmem>>, vector<1x8x128xf32>,
    return
  }
  func.func @transform_0(%arg0: i32, %arg1: i32, %arg2: i32) -> (i32, i32) {
    %c1_i32 = arith.constant 1 : i32
    %0 = arith.muli %arg0, %c1_i32 : i32
    %1 = arith.addi %0, %arg2 : i32
    %c0_i32 = arith.constant 0 : i32
    return %arg1, %1 : i32, i32
  }
  func.func @transform_1(%arg0: i32, %arg1: i32, %arg2: i32) -> (i32, i32) {
    %c1_i32 = arith.constant 1 : i32
    %0 = arith.muli %arg0, %c1_i32 : i32
    %1 = arith.addi %0, %arg2 : i32
    %c0_i32 = arith.constant 0 : i32
    return %arg1, %1 : i32, i32
  }
  func.func @transform_2(%arg0: i32, %arg1: i32, %arg2: i32) -> (i32, i32, i32) {
    %c0_i32 = arith.constant 0 : i32
    %c0_i32_0 = arith.constant 0 : i32
    return %arg0, %arg1, %c0_i32 : i32, i32, i32
  }
  func.func @transform_3(%arg0: i32, %arg1: i32, %arg2: i32) -> (i32, i32, i32) {
    %c0_i32 = arith.constant 0 : i32
    %c0_i32_0 = arith.constant 0 : i32
    return %arg0, %arg1, %c0_i32 : i32, i32, i32
  }
}

</mosaic_0001>

<bundles_post_ra>
// kernel: tpu_custom_call.1
= control target key start
LH: loop header
LB: loop body
LE: loop exit
PB: predicated region body
PF: predicated region fallthrough
CT: control target
= control target key end

     0   :  { %9 = vsyncpa [#allocation3], 0  ;;  %s276_s0 = inlined_call_operand.hbm [shape: f32[8,256], index: 0, kind: input, shape index: {}]   ;;  %s277_s1 = inlined_call_operand.hbm [shape: f32[8,256], index: 1, kind: input, shape index: {}]   ;;  %s278_s2 = inlined_call_operand.hbm [shape: f32[1,8,128], index: 2, kind: output, shape index: {0}]   ;;  %s279_s3 = inlined_call_operand.hbm [shape: f32[1,8,128], index: 3, kind: output, shape index: {1}]  }
   0x1   :  { %10 = vsyncpa [#allocation6], 0 }
   0x2   :  { %11 = vsyncpa [#allocation4], 0 }
   0x3   :  { %12 = vsyncpa [#allocation9], 0  ;;  %s204_s12 = smov [#allocation2]   ;;  %s205_s14 = smov [#allocation5]  }
   0x4   :  { %s23_s13 = sshll.u32 %s204_s12, 4  ;;  %s37_s15 = sshll.u32 %s205_s14, 4  ;;  %s24_s13 = int_to_ptr.vmem [resolvable:$true] %s23_s13  ;;  %s38_s15 = int_to_ptr.vmem [resolvable:$true] %s37_s15 }
   0x5   :  { %s108_s18 = scalar_lea.hbm %s276_s0, 256 }
   0x6   :  { %p109_p0 = scmp.ne.s32.totalorder %s276_s0, %s108_s18  ;;  %p112_p1 = scmp.lt.u32.totalorder %s108_s18, %s276_s0 }
   0x8   :  { %p114_p2 = pnand %p112_p1, %p109_p0 }
   0xa   :  { %117 = shalt.err (!%p114_p2)
}
   0xb   :  { %s118_s23 = scalar_lea.vmem %s24_s13, 256  ;;  %p123_p4 = scmp.lt.s32.totalorder %s24_s13, %s24_s13 }
   0xc   :  { %p119_p3 = scmp.ne.s32.totalorder %s24_s13, %s118_s23  ;;  %p124_p5 = scmp.lt.s32.totalorder %s118_s23, %s118_s23 }
   0xe   :  { %p125_p6 = por %p124_p5, %p123_p4 }
  0x10   :  { %p126_p7 = pnand %p125_p6, %p119_p3 }
  0x12   :  { %129 = shalt.err (!%p126_p7)
}
  0x13   :  { %26 = dma.hbm_to_vmem [thread:$0]  %s276_s0, 256, %s24_s13, [#allocation3]  }
  0x14   :  { %s130_s28 = scalar_lea.hbm %s277_s1, 256 }
  0x15   :  { %p131_p8 = scmp.ne.s32.totalorder %s277_s1, %s130_s28  ;;  %p134_p9 = scmp.lt.u32.totalorder %s130_s28, %s277_s1 }
  0x17   :  { %p136_p10 = pnand %p134_p9, %p131_p8 }
  0x19   :  { %139 = shalt.err (!%p136_p10)
}
  0x1a   :  { %s140_s6 = scalar_lea.vmem %s38_s15, 256  ;;  %p145_p12 = scmp.lt.s32.totalorder %s38_s15, %s38_s15 }
  0x1b   :  { %p141_p11 = scmp.ne.s32.totalorder %s38_s15, %s140_s6  ;;  %p146_p13 = scmp.lt.s32.totalorder %s140_s6, %s140_s6 }
  0x1d   :  { %p147_p0 = por %p146_p13, %p145_p12 }
  0x1f   :  { %p148_p1 = pnand %p147_p0, %p141_p11 }
  0x21   :  { %151 = shalt.err (!%p148_p1)
}
  0x22   :  { %40 = dma.hbm_to_vmem [thread:$0]  %s277_s1, 256, %s38_s15, [#allocation6]  }
  0x23   :  { %196 = dma.done.wait [#allocation3], 256  }
  0x24   :  { %197 = vsyncadd [#allocation3], 4294967040 }
  0x25   :  { %198 = dma.done.wait [#allocation6], 256  }
  0x26   :  { %199 = vsyncadd [#allocation6], 4294967040  ;;  %v57_v0 = vld [vmem:[#allocation2] sm:$0xff]  ;;  %v58_v1 = vld [vmem:[#allocation2 + $0x8] sm:$0xff]  ;;  %s206_s8 = smov [#allocation7]   ;;  %s207_s10 = smov [#allocation8]  }
  0x27   :  { %v59_v2 = vld [vmem:[#allocation5] sm:$0xff]  ;;  %v60_v3 = vld [vmem:[#allocation5 + $0x8] sm:$0xff]  ;;  %s79_s9 = sshll.u32 %s206_s8, 4  ;;  %s89_s11 = sshll.u32 %s207_s10, 4  ;;  %s80_s9 = int_to_ptr.vmem [resolvable:$true] %s79_s9  ;;  %s90_s11 = int_to_ptr.vmem [resolvable:$true] %s89_s11 }
  0x28   :  { %v61_v4 = vmul.f32 %v59_v2, %v57_v0  ;;  %v63_v5 = vadd.f32 %v59_v2, %v57_v0  ;;  %v62_v6 = vmul.f32 %v60_v3, %v58_v1  ;;  %v64_v7 = vadd.f32 %v60_v3, %v58_v1  ;;  %s152_s1 = scalar_lea.vmem %s80_s9, 128  ;;  %p157_p3 = scmp.lt.s32.totalorder %s80_s9, %s80_s9 }
  0x29   :  { %p153_p2 = scmp.ne.s32.totalorder %s80_s9, %s152_s1  ;;  %p158_p4 = scmp.lt.s32.totalorder %s152_s1, %s152_s1 }
  0x2a   :  { %v69_v8 = vadd.f32 %v62_v6, %v61_v4  ;;  %v70_v9 = vadd.f32 %v64_v7, %v63_v5 }
  0x2b   :  { %p159_p5 = por %p158_p4, %p157_p3 }
  0x2c   :  { %71 = vst [vmem:[#allocation7] sm:$0xff] %v69_v8  ;;  %72 = vst [vmem:[#allocation8] sm:$0xff] %v70_v9 }
  0x2d   :  { %p160_p6 = pnand %p159_p5, %p153_p2 }
  0x2f   :  { %163 = shalt.err (!%p160_p6)
}
  0x30   :  { %s164_s14 = scalar_lea.hbm %s278_s2, 128 }
  0x31   :  { %p165_p7 = scmp.ne.s32.totalorder %s278_s2, %s164_s14  ;;  %p168_p8 = scmp.lt.u32.totalorder %s164_s14, %s278_s2 }
  0x33   :  { %p170_p9 = pnand %p168_p8, %p165_p7 }
  0x35   :  { %173 = shalt.err (!%p170_p9)
}
  0x36   :  { %82 = dma.vmem_to_hbm [thread:$0]  %s80_s9, 128, %s278_s2, [#allocation4]  }
  0x37   :  { %s174_s21 = scalar_lea.vmem %s90_s11, 128  ;;  %p179_p11 = scmp.lt.s32.totalorder %s90_s11, %s90_s11 }
  0x38   :  { %p175_p10 = scmp.ne.s32.totalorder %s90_s11, %s174_s21  ;;  %p180_p12 = scmp.lt.s32.totalorder %s174_s21, %s174_s21 }
  0x3a   :  { %p181_p13 = por %p180_p12, %p179_p11 }
  0x3c   :  { %p182_p0 = pnand %p181_p13, %p175_p10 }
  0x3e   :  { %185 = shalt.err (!%p182_p0)
}
  0x3f   :  { %s186_s24 = scalar_lea.hbm %s279_s3, 128 }
  0x40   :  { %p187_p1 = scmp.ne.s32.totalorder %s279_s3, %s186_s24  ;;  %p190_p2 = scmp.lt.u32.totalorder %s186_s24, %s279_s3 }
  0x42   :  { %p192_p3 = pnand %p190_p2, %p187_p1 }
  0x44   :  { %195 = shalt.err (!%p192_p3)
}
  0x45   :  { %92 = dma.vmem_to_hbm [thread:$0]  %s90_s11, 128, %s279_s3, [#allocation9]  }
  0x46   :  { %200 = dma.done.wait [#allocation4], 128  }
  0x47   :  { %201 = vsyncadd [#allocation4], 4294967168 }
  0x48   :  { %202 = dma.done.wait [#allocation9], 128  }
  0x49   :  { %203 = vsyncadd [#allocation9], 4294967168 }
  0x4a   :  { %99 = vsyncpa [#allocation3], 1 }
  0x4b   :  { %100 = vsyncpa [#allocation6], 1 }
  0x4c   :  { %101 = vsyncpa [#allocation4], 1 }
  0x4d   :  { %102 = vsyncpa [#allocation9], 1 }

</bundles_post_ra>
